<compile_context>
chip_gen: v7x
topology: tpu7x:2x2x1
jax: 0.10.0
libtpu: 0.0.40
codegen_flags: <defaults>
</compile_context>

<pallas_src>
import functools

import jax
import jax.numpy as jnp
from jax.experimental import pallas as pl
from jax.experimental.pallas import tpu as pltpu


def _round_up(x, m):
    return pl.cdiv(x, m) * m


def _block_spec(block_shape, index_map, buffer_count=None):
    """BlockSpec, optionally with an explicit pipeline buffer count."""
    if buffer_count is None:
        return pl.BlockSpec(block_shape, index_map)
    try:
        return pl.BlockSpec(block_shape, index_map,
                            pipeline_mode=pl.Buffered(buffer_count))
    except (TypeError, AttributeError):
        # Older JAX without pipeline_mode -> fall back to default buffering.
        return pl.BlockSpec(block_shape, index_map)


def _fused_linear_kernel_single(x_ref, w_ref, b_ref, o_ref, *, precision):
    """o = x @ W_c + b_c for one batch tile, K un-tiled (W_c holds a1/a2)."""
    y = jnp.dot(x_ref[...], w_ref[...],
                preferred_element_type=jnp.float32, precision=precision)
    o_ref[...] = (y + b_ref[...].astype(jnp.float32)).astype(o_ref.dtype)


def _fused_linear_kernel_ktiled(x_ref, w_ref, b_ref, o_ref, acc_ref, *,
                                precision):
    """K-tiled variant: f32 accumulator, init on k==0, writeback on last k."""
    k = pl.program_id(1)

    @pl.when(k == 0)
    def _():
        acc_ref[...] = jnp.zeros_like(acc_ref)

    acc_ref[...] += jnp.dot(x_ref[...], w_ref[...],
                            preferred_element_type=jnp.float32,
                            precision=precision)

    @pl.when(k == pl.num_programs(1) - 1)
    def _():
        o_ref[...] = (acc_ref[...] + b_ref[...].astype(jnp.float32)
                      ).astype(o_ref.dtype)


def linear_combination_forward(x, w1, b1, w2, b2, a1=0.5, a2=0.5, *,
                               block_b=512, block_k=2048,
                               mxu_dtype=None, out_dtype=None, precision=None):
    """Pallas equivalent of LinearCombinationWrapper(nn.Linear, nn.Linear).

    Args:
      x:  (B, D) input.
      w1: (D, H) weight of v1 (pre-transposed vs. PyTorch's (H, D)).
      b1: (1, H) bias of v1.
      w2: (D, H) weight of v2.
      b2: (1, H) bias of v2.
      a1, a2: combination coefficients (compile-time constants in the module).
      block_b: target batch tile (rounded to the 8-row sublane granule).
      block_k: target K (feature) tile; D <= block_k keeps K un-tiled.
      mxu_dtype: optional MXU operand dtype (e.g. jnp.bfloat16) — cast is done
        here in the wrapper, not in the kernel.
      out_dtype: output dtype (defaults to x.dtype); bf16 halves store bytes
        in the memory-bound regime.
      precision: jnp.dot precision (e.g. lax.Precision.HIGHEST for tight f32).
    Returns:
      (B, H) output = a1 * v1(x) + a2 * v2(x).
    """
    B, D = x.shape
    H = w1.shape[1]
    out_dtype = x.dtype if out_dtype is None else out_dtype
    block_b = _round_up(max(block_b, 8), 8)
    block_k = max(block_k, 128)

    # --- Fold the linear combination into one linear layer (exact algebra for
    # linear sub-modules): a1*(xW1+b1) + a2*(xW2+b2) = x@W_c + b_c.
    # With static weights under jit this fold is constant-folded; with
    # per-step weights it is one extra XLA op (see review note).
    w_c = (a1 * w1.astype(jnp.float32) + a2 * w2.astype(jnp.float32))
    b_c = (a1 * b1.astype(jnp.float32) + a2 * b2.astype(jnp.float32)).reshape(1, H)

    # --- MXU operand dtype chosen in the wrapper: halves weight DMA / VMEM and
    # removes the per-step VPU cast inside the kernel.  Accumulation stays f32.
    if mxu_dtype is not None:
        w_c = w_c.astype(mxu_dtype)
        x = x.astype(mxu_dtype)

    # --- Lane-dense output: pad H up to a multiple of 128 (zero columns),
    # only when needed.
    h_pad = _round_up(H, 128)
    if h_pad != H:
        w_c = jnp.pad(w_c, ((0, 0), (0, h_pad - H)))
        b_c = jnp.pad(b_c, ((0, 0), (0, h_pad - H)))

    # --- Batch tiling: balanced tiles (pad waste < one tile), no wrapper-side
    # pad of x; >= 2 grid steps along the parallel axis when possible (v7x
    # megacore).  A full-batch block is used for ragged small batches.
    if B % 8 == 0:
        n_target = max(2 if B >= 16 else 1, pl.cdiv(B, min(block_b, B)))
        tb = _round_up(pl.cdiv(B, n_target), 8)
    else:
        tb = B if B <= block_b else block_b
    nb = pl.cdiv(B, tb)

    # --- K tiling: un-tiled when D fits the target K block.
    if D <= block_k:
        tk, nk = D, 1
    else:
        tk = _round_up(block_k, 128)
        nk = pl.cdiv(D, tk)

    x_itm = jnp.dtype(x.dtype).itemsize
    w_itm = jnp.dtype(w_c.dtype).itemsize
    o_itm = jnp.dtype(out_dtype).itemsize

    def _working_set(tb_, tk_, nk_):
        w_bufs = 1 if nk_ == 1 else 2          # invariant weight -> Buffered(1)
        return (2 * tb_ * tk_ * x_itm          # x, double-buffered
                + w_bufs * tk_ * h_pad * w_itm  # folded weight
                + h_pad * 4                     # bias, single-buffered
                + 2 * tb_ * h_pad * o_itm       # output, double-buffered
                + (tb_ * h_pad * 4 if nk_ > 1 else 0))  # f32 accumulator

    # --- Keep the working set under a v7x-safe budget (64 MiB physical VMEM):
    # shrink the K tile first (weight tile dominates for wide layers), then
    # the batch tile.
    VMEM_BUDGET = 48 * 1024 * 1024
    while _working_set(tb, tk, nk) > VMEM_BUDGET and tk > 128:
        tk = max(128, (tk // 2) // 128 * 128)
        nk = pl.cdiv(D, tk)
    while _working_set(tb, tk, nk) > VMEM_BUDGET and tb > 8:
        tb = max(8, (tb // 2) // 8 * 8)
        nb = pl.cdiv(B, tb)
    # TODO(synk): add an H (N) grid axis for very wide layers where even
    # tk=128 keeps the (tk, h_pad) weight tile above the VMEM budget.

    # --- Zero-pad the K (reduction) dim so tk divides it exactly; zero columns
    # contribute nothing, so this is exact.
    d_eff = nk * tk
    if d_eff != D:
        x = jnp.pad(x, ((0, 0), (0, d_eff - D)))
        w_c = jnp.pad(w_c, ((0, d_eff - D), (0, 0)))

    need = _working_set(tb, tk, nk)
    vmem_limit = int(min(128 * 1024 * 1024, max(32 * 1024 * 1024, 2 * need)))

    single_k = (nk == 1)
    kernel = functools.partial(
        _fused_linear_kernel_single if single_k else _fused_linear_kernel_ktiled,
        precision=precision)
    scratch_shapes = [] if single_k else [pltpu.VMEM((tb, h_pad), jnp.float32)]

    in_specs = [
        # x: streamed per (batch, k) tile, double-buffered by Pallas.
        pl.BlockSpec((tb, tk), lambda i, k: (i, k)),
        # Folded weight: VMEM-resident & single-buffered when K is un-tiled
        # (grid-invariant block), otherwise streamed along k.
        _block_spec((tk, h_pad), lambda i, k: (k, 0),
                    buffer_count=1 if single_k else None),
        # Bias: grid-invariant -> single buffer.
        _block_spec((1, h_pad), lambda i, k: (0, 0), buffer_count=1),
    ]
    out_specs = pl.BlockSpec((tb, h_pad), lambda i, k: (i, 0))

    out = pl.pallas_call(
        kernel,
        out_shape=jax.ShapeDtypeStruct((B, h_pad), out_dtype),
        grid_spec=pltpu.PrefetchScalarGridSpec(
            num_scalar_prefetch=0,
            grid=(nb, nk),
            in_specs=in_specs,
            out_specs=out_specs,
            scratch_shapes=scratch_shapes,
        ),
        compiler_params=pltpu.CompilerParams(
            # Independent batch tiles -> megacore-parallel on v7x; K is a
            # reduction axis and stays last / "arbitrary".
            dimension_semantics=("parallel", "arbitrary"),
            vmem_limit_bytes=vmem_limit,
        ),
    )(x, w_c, b_c)

    return out if h_pad == H else out[:, :H]


if __name__ == "__main__":
    # Small shapes consistent with the module: batch=8, two nn.Linear(32, 32)
    # sub-modules combined with a1 = a2 = 0.5.
    B, D, H = 8, 32, 32
    a1, a2 = 0.5, 0.5

    key = jax.random.PRNGKey(0)
    kx, kw1, kb1, kw2, kb2 = jax.random.split(key, 5)

    x = jax.random.normal(kx, (B, D), dtype=jnp.float32)
    bound = 1.0 / (D ** 0.5)
    w1 = jax.random.uniform(kw1, (D, H), jnp.float32, -bound, bound)
    b1 = jax.random.uniform(kb1, (1, H), jnp.float32, -bound, bound)
    w2 = jax.random.uniform(kw2, (D, H), jnp.float32, -bound, bound)
    b2 = jax.random.uniform(kb2, (1, H), jnp.float32, -bound, bound)

    out = linear_combination_forward(x, w1, b1, w2, b2, a1, a2)
    out = jax.block_until_ready(out)

    # Pure-JAX reference with the module's original (unfolded) math.
    ref = a1 * (x @ w1 + b1) + a2 * (x @ w2 + b2)
    assert out.shape == (B, H), out.shape
    # Tolerance covers MXU operand rounding under default matmul precision
    # plus the (exact-in-real-arithmetic) weight-fold reassociation; pass
    # precision=jax.lax.Precision.HIGHEST for bit-tight f32 results.
    assert jnp.allclose(out, ref, atol=1e-2, rtol=1e-2), "mismatch vs reference"

    print("KERNEL_OK")
</pallas_src>

<mosaic_0001>
module attributes {stable_mosaic.version = 11 : i64} {
  func.func @_fused_linear_kernel_single(%arg0: i32, %arg1: i32, %arg2: memref<8x32xf32, #tpu.memory_space<vmem>>, %arg3: memref<32x128xf32, #tpu.memory_space<vmem>>, %arg4: memref<1x128xf32, #tpu.memory_space<vmem>>, %arg5: memref<8x128xf32, #tpu.memory_space<vmem>>) attributes {dimension_semantics = [#tpu.dimension_semantics<parallel>, #tpu.dimension_semantics<arbitrary>], iteration_bounds = array<i64: 1, 1>, scalar_prefetch = 0 : i64, scratch_operands = 0 : i64, tpu.core_type = #tpu.core_type<tc>, window_params = [{transform_indices = @transform_0, window_bounds = array<i64: 8, 32>}, {pipeline_mode = #tpu.pipeline_mode<synchronous>, transform_indices = @transform_1, window_bounds = array<i64: 32, 128>}, {pipeline_mode = #tpu.pipeline_mode<synchronous>, transform_indices = @transform_2, window_bounds = array<i64: 1, 128>}, {transform_indices = @transform_3, window_bounds = array<i64: 8, 128>}]} {
    %c0 = arith.constant 0 : index
    %c0_0 = arith.constant 0 : index
    %0 = vector.load %arg2[%c0, %c0_0] : memref<8x32xf32, #tpu.memory_space<vmem>>, vector<8x32xf32>
    %c0_1 = arith.constant 0 : index
    %c0_2 = arith.constant 0 : index
    %1 = vector.load %arg3[%c0_1, %c0_2] : memref<32x128xf32, #tpu.memory_space<vmem>>, vector<32x128xf32>
    %cst = arith.constant dense<0.000000e+00> : vector<8x128xf32>
    %2 = tpu.matmul %0, %1, %cst {dimension_numbers = #tpu.dot_dimension_numbers<[1], [0], [0], [1], [0, 0, 1, 1], [], []>} : vector<8x32xf32>, vector<32x128xf32>, vector<8x128xf32> -> vector<8x128xf32>
    %c0_3 = arith.constant 0 : index
    %c0_4 = arith.constant 0 : index
    %3 = vector.load %arg4[%c0_3, %c0_4] : memref<1x128xf32, #tpu.memory_space<vmem>>, vector<1x128xf32>
    %4 = vector.broadcast %3 : vector<1x128xf32> to vector<8x128xf32>
    %5 = arith.addf %2, %4 : vector<8x128xf32>
    %c0_5 = arith.constant 0 : index
    %c0_6 = arith.constant 0 : index
    %6 = vector.load %arg5[%c0_5, %c0_6] : memref<8x128xf32, #tpu.memory_space<vmem>>, vector<8x128xf32>
    tpu.vector_store %arg5[%c0_5, %c0_6], %5 {strides = array<i32>} : memref<8x128xf32, #tpu.memory_space<vmem>>, vector<8x128xf32>,
    return
  }
  func.func @transform_0(%arg0: i32, %arg1: i32) -> (i32, i32) {
    %c0_i32 = arith.constant 0 : i32
    return %arg0, %arg1 : i32, i32
  }
  func.func @transform_1(%arg0: i32, %arg1: i32) -> (i32, i32) {
    %c0_i32 = arith.constant 0 : i32
    %c0_i32_0 = arith.constant 0 : i32
    return %arg1, %c0_i32 : i32, i32
  }
  func.func @transform_2(%arg0: i32, %arg1: i32) -> (i32, i32) {
    %c0_i32 = arith.constant 0 : i32
    %c0_i32_0 = arith.constant 0 : i32
    %c0_i32_1 = arith.constant 0 : i32
    return %c0_i32, %c0_i32_0 : i32, i32
  }
  func.func @transform_3(%arg0: i32, %arg1: i32) -> (i32, i32) {
    %c0_i32 = arith.constant 0 : i32
    %c0_i32_0 = arith.constant 0 : i32
    return %arg0, %c0_i32 : i32, i32
  }
}

</mosaic_0001>

<bundles_post_ra>
// kernel: tpu_custom_call.1
= control target key start
LH: loop header
LB: loop body
LE: loop exit
PB: predicated region body
PF: predicated region fallthrough
CT: control target
= control target key end

     0   :  { %8 = vsyncpa [#allocation3], 0  ;;  %s322_s0 = inlined_call_operand.hbm [shape: f32[8,32], index: 0, kind: input, shape index: {}]   ;;  %s323_s1 = inlined_call_operand.hbm [shape: f32[32,128], index: 1, kind: input, shape index: {}]   ;;  %s324_s2 = inlined_call_operand.vmem [shape: f32[1,128], index: 2, kind: input, shape index: {}]   ;;  %s325_s3 = inlined_call_operand.hbm [shape: f32[8,128], index: 3, kind: output, shape index: {}]  }
   0x1   :  { %9 = vsyncpa [#allocation6], 0 }
   0x2   :  { %10 = vsyncpa [#allocation4], 0  ;;  %s248_s12 = smov [#allocation2]   ;;  %s249_s14 = smov [#allocation5]  }
   0x3   :  { %s17_s13 = sshll.u32 %s248_s12, 4  ;;  %s26_s15 = sshll.u32 %s249_s14, 4  ;;  %s18_s13 = int_to_ptr.vmem [resolvable:$true] %s17_s13  ;;  %s276_s15 = int_to_ptr.vmem [resolvable:$true] %s26_s15 }
   0x4   :  { %s176_s18 = scalar_lea.hbm %s322_s0, 128 }
   0x5   :  { %p177_p0 = scmp.ne.s32.totalorder %s322_s0, %s176_s18  ;;  %p180_p1 = scmp.lt.u32.totalorder %s176_s18, %s322_s0 }
   0x7   :  { %p182_p2 = pnand %p180_p1, %p177_p0 }
   0x9   :  { %185 = shalt.err (!%p182_p2)
}
   0xa   :  { %s186_s23 = scalar_lea.vmem %s18_s13, 128  ;;  %p191_p4 = scmp.lt.s32.totalorder %s18_s13, %s18_s13 }
   0xb   :  { %p187_p3 = scmp.ne.s32.totalorder %s18_s13, %s186_s23  ;;  %p192_p5 = scmp.lt.s32.totalorder %s186_s23, %s186_s23 }
   0xd   :  { %p193_p6 = por %p192_p5, %p191_p4 }
   0xf   :  { %p194_p7 = pnand %p193_p6, %p187_p3 }
  0x11   :  { %197 = shalt.err (!%p194_p7)
}
  0x12   :  { %20 = dma.hbm_to_vmem [thread:$0]  %s322_s0, 128, %s18_s13, [#allocation3]  }
  0x13   :  { %s198_s28 = scalar_lea.hbm %s323_s1, 512 }
  0x14   :  { %p199_p8 = scmp.ne.s32.totalorder %s323_s1, %s198_s28  ;;  %p202_p9 = scmp.lt.u32.totalorder %s198_s28, %s323_s1 }
  0x16   :  { %p204_p10 = pnand %p202_p9, %p199_p8 }
  0x18   :  { %207 = shalt.err (!%p204_p10)
}
  0x19   :  { %s208_s6 = scalar_lea.vmem %s276_s15, 512  ;;  %p213_p12 = scmp.lt.s32.totalorder %s276_s15, %s276_s15 }
  0x1a   :  { %p209_p11 = scmp.ne.s32.totalorder %s276_s15, %s208_s6  ;;  %p214_p13 = scmp.lt.s32.totalorder %s208_s6, %s208_s6 }
  0x1c   :  { %p215_p0 = por %p214_p13, %p213_p12 }
  0x1e   :  { %p216_p1 = pnand %p215_p0, %p209_p11 }
  0x20   :  { %219 = shalt.err (!%p216_p1)
}
  0x21   :  { %s250_s0 = smov 128   ;;  %s251_s7 = smov 8  }
  0x22   :  { %32 = dma.hbm_to_vmem [thread:$0]  %s323_s1, 512, %s276_s15, [#allocation6], %s250_s0, %s250_s0, %s251_s7  }
  0x23   :  { %242 = dma.done.wait [#allocation3], 128  }
  0x24   :  { %243 = vsyncadd [#allocation3], 4294967168 }
  0x25   :  { %244 = dma.done.wait [#allocation6], 512  }
  0x26   :  { %245 = vsyncadd [#allocation6], 4294966784  ;;  %v252_v0 = vmov 0.0|0.0   ;;  %vm253_vm0 = vmmov 0   ;;  %v254_v1 = vmov 0.0   ;;  %v42_v2 = vld [vmem:[#allocation5] sm:$0xff] }
  0x27   :  { %162 = vmatprep.subr.bf16.mxu0 %v252_v0  ;;  %159 = vmatprep.mubr.msk.f32.mxu0 %vm253_vm0, %v254_v1  ;;  %v43_v3 = vld [vmem:[#allocation5 + $0x8] sm:$0xff]  ;;  %v44_v4 = vld [vmem:[#allocation5 + $0x10] sm:$0xff]  ;;  %v45_v6 = vld [vmem:[#allocation5 + $0x18] sm:$0xff]  ;;  %vm53_vm1 = vcmask 261120   ;;  %s255_s11 = smov [#allocation7]  }
  0x28   :  { %v163_v5 = vpack.c.bf16 %v43_v3, %v42_v2  ;;  %v166_v7 = vpack.c.bf16 %v45_v6, %v44_v4  ;;  %v41_v8 = vld [vmem:[#allocation2] sm:$0xff]  ;;  %s134_s12 = sshll.u32 %s255_s11, 4  ;;  %s135_s12 = int_to_ptr.vmem [resolvable:$true] %s134_s12 }
  0x29   :  { %v144_v9 = vld [vmem:[%s324_s2] ss:$0 sm:$0xff]  ;;  %s220_s13 = scalar_lea.vmem %s135_s12, 128  ;;  %p225_p3 = scmp.lt.s32.totalorder %s135_s12, %s135_s12 }
  0x2a   :  { %164 = vmatpush3.bf16.msra.mxu0 %v163_v5  ;;  %p221_p2 = scmp.ne.s32.totalorder %s135_s12, %s220_s13  ;;  %p226_p4 = scmp.lt.s32.totalorder %s220_s13, %s220_s13 }
  0x2b   :  { %165 = vmatprep.subr.bf16.mxu0 %v252_v0 }
  0x2c   :  { %p227_p5 = por %p226_p4, %p225_p3 }
  0x2e   :  { %167 = vmatpush3.bf16.msra.mxu0 %v166_v7  ;;  %p228_p6 = pnand %p227_p5, %p221_p2 }
  0x31   :  { %160 = vmatmul.mubr.msk.f32.vlgmr.msra.gmra.mrb[0].mxu0 %vm53_vm1, %v41_v8 }
 0x104   :  { %v123_v10 = vpop.f32.mrb[0].mxu0 }
 0x105   :  { %v124_v11 = vadd.f32 %v144_v9, %v123_v10  ;;  %v161_v12 = vpop.f32.mrb[1].mxu0 }
 0x107   :  { %127 = vst [vmem:[#allocation7] sm:$0xff] %v124_v11 }
 0x108   :  { %231 = shalt.err (!%p228_p6)
}
 0x109   :  { %s232_s16 = scalar_lea.hbm %s325_s3, 128 }
 0x10a   :  { %p233_p7 = scmp.ne.s32.totalorder %s325_s3, %s232_s16  ;;  %p236_p8 = scmp.lt.u32.totalorder %s232_s16, %s325_s3 }
 0x10c   :  { %p238_p9 = pnand %p236_p8, %p233_p7 }
 0x10e   :  { %241 = shalt.err (!%p238_p9)
}
 0x10f   :  { %137 = dma.vmem_to_hbm [thread:$0]  %s135_s12, 128, %s325_s3, [#allocation4]  }
 0x110   :  { %246 = dma.done.wait [#allocation4], 128  }
 0x111   :  { %247 = vsyncadd [#allocation4], 4294967168 }
 0x112   :  { %141 = vsyncpa [#allocation3], 1 }
 0x113   :  { %142 = vsyncpa [#allocation6], 1 }
 0x114   :  { %143 = vsyncpa [#allocation4], 1 }

</bundles_post_ra>
